<compile_context>
chip_gen: v5e
topology: v5e:2x2
jax: 0.10.0
libtpu: 0.0.40
codegen_flags: <defaults>
</compile_context>

<pallas_src>
from functools import partial

import jax
import jax.numpy as jnp
import numpy as np
from jax.experimental import pallas as pl
from jax.experimental.pallas import tpu as pltpu

CLIP_MEAN = (0.48145466, 0.4578275, 0.40821073)
CLIP_STD = (0.26862954, 0.26130258, 0.27577711)

LANE = 128


def _round_up(x, m):
    return ((x + m - 1) // m) * m


def _pick_tm(m, tm_max):
    """M-tile size: multiple of 16 (bf16 sublane packing); when M fits in
    <= 2*tm_max rows, split it into (at least) two tiles so the 'parallel'
    grid axis can shard across both TensorCores on v7x."""
    m16 = _round_up(max(m, 1), 16)
    if m16 <= 16:
        return 16
    if m16 <= 2 * tm_max:
        return min(tm_max, _round_up((m16 + 1) // 2, 16))
    return tm_max


# ---------------------------------------------------------------------------
# Fused kernels: (x @ W' + b) -> L2-normalize rows -> chord distance against
# pre-normalized text embeds, i.e. sqrt(2 - 2 * <f_hat, e_hat>).
# ---------------------------------------------------------------------------
def _encode_chord_single_kernel(x_ref, w_ref, b_ref, e_ref, o_ref):
    # Single grid step: whole K contraction in one MXU call, no accumulator.
    f = jnp.dot(x_ref[...], w_ref[...],
                preferred_element_type=jnp.float32) + b_ref[...]      # [tm, D] f32
    sumsq = jnp.sum(f * f, axis=-1, keepdims=True)                    # [tm, 1]
    # F.normalize(eps=1e-12):  f / max(||f||, 1e-12) == f * rsqrt(max(ss, 1e-24))
    f_hat = f * jax.lax.rsqrt(jnp.maximum(sumsq, 1e-24))
    cos = jnp.dot(f_hat, e_ref[...], preferred_element_type=jnp.float32)
    # chord = ||f_hat - e_hat|| = sqrt(2 - 2 cos) for unit vectors (keep f32).
    o_ref[...] = jnp.sqrt(jnp.maximum(2.0 - 2.0 * cos, 0.0))


def _encode_chord_tiled_kernel(x_ref, w_ref, b_ref, e_ref, o_ref, acc_ref):
    k = pl.program_id(1)

    @pl.when(k == 0)
    def _():
        # Fold the bias into the accumulator init (saves a VALU add at finalize).
        acc_ref[...] = jnp.broadcast_to(b_ref[...], acc_ref.shape)

    # bf16 x bf16 -> f32 accumulate on the MXU.
    acc_ref[...] += jnp.dot(x_ref[...], w_ref[...],
                            preferred_element_type=jnp.float32)

    @pl.when(k == pl.num_programs(1) - 1)
    def _():
        f = acc_ref[...]                                              # [tm, D] f32
        sumsq = jnp.sum(f * f, axis=-1, keepdims=True)                # [tm, 1]
        f_hat = f * jax.lax.rsqrt(jnp.maximum(sumsq, 1e-24))
        cos = jnp.dot(f_hat, e_ref[...], preferred_element_type=jnp.float32)
        o_ref[...] = jnp.sqrt(jnp.maximum(2.0 - 2.0 * cos, 0.0))


def encode_and_chord(x_flat, w, b, e_t, *, tk=2048, tm_max=256, single_step_k=4096):
    """x_flat [M, K] bf16, w [K, D] bf16, b [1, D] f32, e_t [D, T_pad] f32
    -> chord distances [M, T_pad] f32."""
    m, k_dim = x_flat.shape
    kd, d = w.shape
    assert kd == k_dim
    t_pad = e_t.shape[1]

    tm = _pick_tm(m, tm_max)
    m_pad = _round_up(_round_up(m, 16), tm)
    if m_pad != m:
        x_flat = jnp.pad(x_flat, ((0, m_pad - m), (0, 0)))
    m_tiles = m_pad // tm

    if k_dim <= single_step_k:
        # Small-K path: one contraction step, no reduction grid axis / scratch.
        out = pl.pallas_call(
            _encode_chord_single_kernel,
            out_shape=jax.ShapeDtypeStruct((m_pad, t_pad), jnp.float32),
            grid_spec=pltpu.PrefetchScalarGridSpec(
                num_scalar_prefetch=0,
                grid=(m_tiles,),
                in_specs=[
                    pl.BlockSpec((tm, k_dim), lambda i: (i, 0)),      # x tile
                    pl.BlockSpec((k_dim, d), lambda i: (0, 0)),       # weight (resident)
                    pl.BlockSpec((1, d), lambda i: (0, 0)),           # bias (resident)
                    pl.BlockSpec((d, t_pad), lambda i: (0, 0)),       # embeds (resident)
                ],
                out_specs=pl.BlockSpec((tm, t_pad), lambda i: (i, 0)),
            ),
            compiler_params=pltpu.CompilerParams(
                dimension_semantics=("parallel",)),
        )(x_flat, w, b, e_t)
        return out[:m]

    # Large-K path: K-tiled reduction. Pad K with zeros to a multiple of tk
    # (zeros contribute nothing to the dot) instead of the old tk=K fallback.
    tk = max(LANE, _round_up(min(tk, k_dim), LANE))
    k_pad = _round_up(k_dim, tk)
    if k_pad != k_dim:
        x_flat = jnp.pad(x_flat, ((0, 0), (0, k_pad - k_dim)))
        w = jnp.pad(w, ((0, k_pad - k_dim), (0, 0)))

    vmem_bytes = (3 * (tm * tk + tk * d) * 2          # triple-buffered bf16 x & w tiles
                  + 2 * (tm * t_pad) * 4              # double-buffered output block
                  + 2 * (d * t_pad + d) * 4           # resident embeds + bias
                  + tm * d * 4                        # f32 accumulator scratch
                  + (1 << 20))                        # slack
    vmem_limit = min(max(_round_up(vmem_bytes, 1 << 20), 32 << 20), 48 << 20)

    grid = (m_tiles, k_pad // tk)
    out = pl.pallas_call(
        _encode_chord_tiled_kernel,
        out_shape=jax.ShapeDtypeStruct((m_pad, t_pad), jnp.float32),
        grid_spec=pltpu.PrefetchScalarGridSpec(
            num_scalar_prefetch=0,
            grid=grid,
            in_specs=[
                pl.BlockSpec((tm, tk), lambda i, kk: (i, kk),
                             pipeline_mode=pl.Buffered(3)),           # x tile
                pl.BlockSpec((tk, d), lambda i, kk: (kk, 0),
                             pipeline_mode=pl.Buffered(3)),           # weight tile
                pl.BlockSpec((1, d), lambda i, kk: (0, 0)),           # bias (resident)
                pl.BlockSpec((d, t_pad), lambda i, kk: (0, 0)),       # embeds (resident)
            ],
            out_specs=pl.BlockSpec((tm, t_pad), lambda i, kk: (i, 0)),
            scratch_shapes=[pltpu.VMEM((tm, d), jnp.float32)],
        ),
        compiler_params=pltpu.CompilerParams(
            dimension_semantics=("parallel", "arbitrary"),
            vmem_limit_bytes=vmem_limit),
    )(x_flat, w, b, e_t)
    return out[:m]


# ---------------------------------------------------------------------------
# Whole forward (kernel + tiny elementwise tail) in one jit -> one dispatch.
# ---------------------------------------------------------------------------
@partial(jax.jit, static_argnames=("cutn", "num_texts"))
def _forward(x_flat, w, b, e_t, weights_vec, *, cutn, num_texts):
    n = x_flat.shape[0]
    chord = encode_and_chord(x_flat, w, b, e_t)[:, :num_texts]        # [n, T]
    # TODO(synk): arcsin tail kept in plain JAX (not verified to lower in Mosaic);
    # it is n*T elements so it is negligible and fused by XLA inside this jit.
    dists = (jnp.arcsin(chord * 0.5) ** 2) * 2.0                      # [n, T]
    # abs(w) * (d * sign(w)) == w * d  (forward-identical to the PyTorch module)
    weighted = dists * weights_vec[None, :]                           # [n, T]
    return jnp.broadcast_to(weighted.T[:, None, None, :],
                            (num_texts, cutn, 1, n))                  # [T, cutn, 1, n]


# ---------------------------------------------------------------------------
# Module equivalent
# ---------------------------------------------------------------------------
class ClipDiscriminator:
    def __init__(self, key, cutn, texts, img_res=16, channels=3, feat_dim=128):
        self.cutn = cutn
        self.input_resolution = img_res
        self.num_texts = len(texts)
        hw = img_res * img_res
        chw = channels * hw

        k_proj, *k_embeds = jax.random.split(key, 1 + len(texts))

        # TODO(synk): full CLIP ViT encode_image has no clean single-kernel Pallas
        # equivalent; replaced by a deterministic linear projection stand-in.
        w0 = 0.02 * jax.random.normal(k_proj, (chw, feat_dim), jnp.float32)

        # Fold transforms.Normalize into the projection (done once at init):
        #   (x - mean)/std @ W == x @ (W * inv_std[:,None]) + (-(mean*inv_std) @ W)
        mean_flat = jnp.repeat(jnp.asarray(CLIP_MEAN[:channels], jnp.float32), hw)
        inv_std_flat = jnp.repeat(1.0 / jnp.asarray(CLIP_STD[:channels], jnp.float32), hw)
        # NOTE: bf16 weights/inputs quantize the Normalize+projection vs an f32
        # reference; validated against an f32 _ref with tolerance in __main__.
        self.w = (w0 * inv_std_flat[:, None]).astype(jnp.bfloat16)            # [CHW, D]
        self.b = (-(mean_flat * inv_std_flat) @ w0)[None, :].astype(jnp.float32)

        # TODO(synk): clip.encode_text replaced by deterministic random text embeds.
        e = jnp.stack([jax.random.normal(k, (feat_dim,), jnp.float32)
                       for k in k_embeds])                                    # [T, D]
        e_hat = e * jax.lax.rsqrt(
            jnp.maximum(jnp.sum(e * e, axis=-1, keepdims=True), 1e-24))
        t_pad = _round_up(max(self.num_texts, 1), LANE)                       # lane-dense out
        e_pad = jnp.zeros((t_pad, feat_dim), jnp.float32).at[:self.num_texts].set(e_hat)
        self.e_t = e_pad.T                                                    # [D, T_pad] f32

        # TODO(synk): replace_grad trick only affects backward; forward-identical here.
        self.weights_vec = jnp.asarray([float(wgt) for _, wgt in texts], jnp.float32)

    def __call__(self, x, n):
        # TODO(synk): real MakeCutouts yields cutn distinct random power-law crops
        # (+ DifferentiableAugmentations); the deterministic full-image stand-in
        # makes all cutn cutouts identical, so features are computed once per
        # unique image and broadcast over the cutn axis (cutn-fold HBM/MXU saving).
        x_flat = x.reshape(n, -1).astype(jnp.bfloat16)                        # [n, CHW]
        stacked = _forward(x_flat, self.w, self.b, self.e_t, self.weights_vec,
                           cutn=self.cutn, num_texts=self.num_texts)          # [T, cutn, 1, n]
        return [stacked[t] for t in range(self.num_texts)]


if __name__ == "__main__":
    key = jax.random.PRNGKey(0)
    kx, kp = jax.random.split(key)
    n = 2                                                                     # batch
    x = jax.random.uniform(kx, (n, 3, 16, 16), jnp.float32)                   # NCHW
    texts = [("a photo of a cat", 1.0), ("blurry", -0.5)]
    disc = ClipDiscriminator(kp, cutn=4, texts=texts,
                             img_res=16, channels=3, feat_dim=128)
    results = disc(x, n)
    for r in results:
        jax.block_until_ready(r)
        assert r.shape == (4, 1, n), r.shape

    # Pure-JAX f32 reference with the same folded params / input quantization.
    x_ref = x.reshape(n, -1).astype(jnp.bfloat16).astype(jnp.float32)
    f = x_ref @ disc.w.astype(jnp.float32) + disc.b
    f_hat = f / jnp.maximum(jnp.linalg.norm(f, axis=-1, keepdims=True), 1e-12)
    e_hat = disc.e_t.T[:disc.num_texts]
    chord_ref = jnp.linalg.norm(f_hat[:, None, :] - e_hat[None, :, :], axis=-1)
    dists_ref = (jnp.arcsin(chord_ref * 0.5) ** 2) * 2.0
    for t, (_, wgt) in enumerate(texts):
        np.testing.assert_allclose(np.asarray(results[t][0, 0, :]),
                                   np.asarray(wgt * dists_ref[:, t]),
                                   rtol=5e-2, atol=5e-2)
    print("KERNEL_OK")
</pallas_src>

<mosaic_0001>
module attributes {stable_mosaic.version = 11 : i64} {
  func.func @_encode_chord_single_kernel(%arg0: i32, %arg1: memref<16x768xbf16, #tpu.memory_space<vmem>>, %arg2: memref<768x128xbf16, #tpu.memory_space<vmem>>, %arg3: memref<1x128xf32, #tpu.memory_space<vmem>>, %arg4: memref<128x128xf32, #tpu.memory_space<vmem>>, %arg5: memref<16x128xf32, #tpu.memory_space<vmem>>) attributes {dimension_semantics = [#tpu.dimension_semantics<parallel>], iteration_bounds = array<i64: 1>, scalar_prefetch = 0 : i64, scratch_operands = 0 : i64, tpu.core_type = #tpu.core_type<tc>, window_params = [{transform_indices = @transform_0, window_bounds = array<i64: 16, 768>}, {pipeline_mode = #tpu.pipeline_mode<synchronous>, transform_indices = @transform_1, window_bounds = array<i64: 768, 128>}, {pipeline_mode = #tpu.pipeline_mode<synchronous>, transform_indices = @transform_2, window_bounds = array<i64: 1, 128>}, {pipeline_mode = #tpu.pipeline_mode<synchronous>, transform_indices = @transform_3, window_bounds = array<i64: 128, 128>}, {transform_indices = @transform_4, window_bounds = array<i64: 16, 128>}]} {
    %c0 = arith.constant 0 : index
    %c0_0 = arith.constant 0 : index
    %0 = vector.load %arg1[%c0, %c0_0] : memref<16x768xbf16, #tpu.memory_space<vmem>>, vector<16x768xbf16>
    %c0_1 = arith.constant 0 : index
    %c0_2 = arith.constant 0 : index
    %1 = vector.load %arg2[%c0_1, %c0_2] : memref<768x128xbf16, #tpu.memory_space<vmem>>, vector<768x128xbf16>
    %cst = arith.constant dense<0.000000e+00> : vector<16x128xf32>
    %2 = tpu.matmul %0, %1, %cst {dimension_numbers = #tpu.dot_dimension_numbers<[1], [0], [0], [1], [0, 0, 1, 1], [], []>} : vector<16x768xbf16>, vector<768x128xbf16>, vector<16x128xf32> -> vector<16x128xf32>
    %c0_3 = arith.constant 0 : index
    %c0_4 = arith.constant 0 : index
    %3 = vector.load %arg3[%c0_3, %c0_4] : memref<1x128xf32, #tpu.memory_space<vmem>>, vector<1x128xf32>
    %4 = vector.broadcast %3 : vector<1x128xf32> to vector<16x128xf32>
    %5 = arith.addf %2, %4 : vector<16x128xf32>
    %6 = arith.mulf %5, %5 : vector<16x128xf32>
    %cst_5 = arith.constant dense<0.000000e+00> : vector<16xf32>
    %7 = vector.multi_reduction <add>, %6, %cst_5 [1] : vector<16x128xf32> to vector<16xf32>
    %8 = vector.shape_cast %7 : vector<16xf32> to vector<16x1xf32>
    %cst_6 = arith.constant 1.000000e-24 : f32
    %9 = vector.broadcast %cst_6 : f32 to vector<16x1xf32>
    %10 = arith.maximumf %8, %9 : vector<16x1xf32>
    %11 = math.rsqrt %10 : vector<16x1xf32>
    %12 = vector.broadcast %11 : vector<16x1xf32> to vector<16x128xf32>
    %13 = arith.mulf %5, %12 : vector<16x128xf32>
    %c0_7 = arith.constant 0 : index
    %c0_8 = arith.constant 0 : index
    %14 = vector.load %arg4[%c0_7, %c0_8] : memref<128x128xf32, #tpu.memory_space<vmem>>, vector<128x128xf32>
    %cst_9 = arith.constant dense<0.000000e+00> : vector<16x128xf32>
    %15 = tpu.matmul %13, %14, %cst_9 {dimension_numbers = #tpu.dot_dimension_numbers<[1], [0], [0], [1], [0, 0, 1, 1], [], []>} : vector<16x128xf32>, vector<128x128xf32>, vector<16x128xf32> -> vector<16x128xf32>
    %cst_10 = arith.constant 2.000000e+00 : f32
    %16 = vector.broadcast %cst_10 : f32 to vector<16x128xf32>
    %17 = arith.mulf %16, %15 : vector<16x128xf32>
    %cst_11 = arith.constant 2.000000e+00 : f32
    %18 = vector.broadcast %cst_11 : f32 to vector<16x128xf32>
    %19 = arith.subf %18, %17 : vector<16x128xf32>
    %cst_12 = arith.constant 0.000000e+00 : f32
    %20 = vector.broadcast %cst_12 : f32 to vector<16x128xf32>
    %21 = arith.maximumf %19, %20 : vector<16x128xf32>
    %22 = math.sqrt %21 : vector<16x128xf32>
    %c0_13 = arith.constant 0 : index
    %c0_14 = arith.constant 0 : index
    %23 = vector.load %arg5[%c0_13, %c0_14] : memref<16x128xf32, #tpu.memory_space<vmem>>, vector<16x128xf32>
    tpu.vector_store %arg5[%c0_13, %c0_14], %22 {strides = array<i32>} : memref<16x128xf32, #tpu.memory_space<vmem>>, vector<16x128xf32>,
    return
  }
  func.func @transform_0(%arg0: i32) -> (i32, i32) {
    %c0_i32 = arith.constant 0 : i32
    %c0_i32_0 = arith.constant 0 : i32
    return %arg0, %c0_i32 : i32, i32
  }
  func.func @transform_1(%arg0: i32) -> (i32, i32) {
    %c0_i32 = arith.constant 0 : i32
    %c0_i32_0 = arith.constant 0 : i32
    %c0_i32_1 = arith.constant 0 : i32
    return %c0_i32, %c0_i32_0 : i32, i32
  }
  func.func @transform_2(%arg0: i32) -> (i32, i32) {
    %c0_i32 = arith.constant 0 : i32
    %c0_i32_0 = arith.constant 0 : i32
    %c0_i32_1 = arith.constant 0 : i32
    return %c0_i32, %c0_i32_0 : i32, i32
  }
  func.func @transform_3(%arg0: i32) -> (i32, i32) {
    %c0_i32 = arith.constant 0 : i32
    %c0_i32_0 = arith.constant 0 : i32
    %c0_i32_1 = arith.constant 0 : i32
    return %c0_i32, %c0_i32_0 : i32, i32
  }
  func.func @transform_4(%arg0: i32) -> (i32, i32) {
    %c0_i32 = arith.constant 0 : i32
    %c0_i32_0 = arith.constant 0 : i32
    return %arg0, %c0_i32 : i32, i32
  }
}

</mosaic_0001>

<bundles_post_ra>
// kernel: _forward.1
= control target key start
LH: loop header
LB: loop body
LE: loop exit
PB: predicated region body
PF: predicated region fallthrough
CT: control target
= control target key end

     0   :  { %9 = vsyncpa [#allocation3], 0  ;;  %s1083_s0 = inlined_call_operand.vmem [shape: bf16[16,768], index: 0, kind: input, shape index: {}]   ;;  %s1084_s1 = inlined_call_operand.hbm [shape: bf16[768,128], index: 1, kind: input, shape index: {}]   ;;  %s1085_s2 = inlined_call_operand.vmem [shape: f32[1,128], index: 2, kind: input, shape index: {}]   ;;  %s1086_s3 = inlined_call_operand.hbm [shape: f32[128,128], index: 3, kind: input, shape index: {}]   ;;  %s1087_s4 = inlined_call_operand.vmem [shape: f32[16,128], index: 4, kind: output, shape index: {}]  }
   0x1   :  { %s17_s17 = sshll.u32 %s1084_s1, 4  ;;  %s18_s17 = int_to_ptr.hbm [resolvable:$true] %s17_s17 }
   0x2   :  { %10 = vsyncpa [#allocation5], 0  ;;  %s1001_s18 = smov [#allocation2]   ;;  %s32_s22 = sshll.u32 %s1086_s3, 4  ;;  %s33_s22 = int_to_ptr.hbm [resolvable:$true] %s32_s22 }
   0x3   :  { %s19_s19 = sshll.u32 %s1001_s18, 4  ;;  %s1002_s23 = smov 64   ;;  %s20_s19 = int_to_ptr.vmem [resolvable:$true] %s19_s19 }
   0x4   :  { %s1003_s24 = smov 4   ;;  %s1004_s25 = smov [#allocation4]  }
   0x5   :  { %25 = dma.hbm_to_vmem [thread:$0]  %s18_s17, 6144, %s20_s19, [#allocation3], %s1002_s23, %s1002_s23, %s1003_s24  }
   0x6   :  { %s34_s26 = sshll.u32 %s1004_s25, 4  ;;  %s1005_s27 = smov 128   ;;  %s35_s26 = int_to_ptr.vmem [resolvable:$true] %s34_s26 }
   0x7   :  { %s1006_s28 = smov 8  }
   0x8   :  { %40 = dma.hbm_to_vmem [thread:$0]  %s33_s22, 2048, %s35_s26, [#allocation5], %s1005_s27, %s1005_s27, %s1006_s28  }
   0x9   :  { %997 = dma.done.wait [#allocation3], 6144  }
   0xa   :  { %998 = vsyncadd [#allocation3], 4294961152 }
   0xb   :  { %999 = dma.done.wait [#allocation5], 2048  }
   0xc   :  { %1000 = vsyncadd [#allocation5], 4294965248  ;;  %v893_v0 = vld [vmem:[#allocation2 + $0x38] sm:$0xff]  ;;  %v892_v4 = vld [vmem:[#allocation2 + $0x30] sm:$0xff] }
   0xd   :  { %v901_v1 = vld [vmem:[#allocation2 + $0x78] sm:$0xff]  ;;  %473 = vmatpush.bf16.msra.mxu0 %v893_v0  ;;  %v900_v5 = vld [vmem:[#allocation2 + $0x70] sm:$0xff]  ;;  %v891_v8 = vld [vmem:[#allocation2 + $0x28] sm:$0xff] }
   0xe   :  { %v909_v2 = vld [vmem:[#allocation2 + $0xb8] sm:$0xff]  ;;  %487 = vmatpush.bf16.msra.mxu1 %v901_v1  ;;  %v908_v6 = vld [vmem:[#allocation2 + $0xb0] sm:$0xff]  ;;  %v899_v9 = vld [vmem:[#allocation2 + $0x68] sm:$0xff] }
   0xf   :  { %v917_v3 = vld [vmem:[#allocation2 + $0xf8] sm:$0xff]  ;;  %501 = vmatpush.bf16.msra.mxu2 %v909_v2  ;;  %v916_v7 = vld [vmem:[#allocation2 + $0xf0] sm:$0xff]  ;;  %v907_v10 = vld [vmem:[#allocation2 + $0xa8] sm:$0xff] }
  0x10   :  { %515 = vmatpush.bf16.msra.mxu3 %v917_v3  ;;  %v915_v11 = vld [vmem:[#allocation2 + $0xe8] sm:$0xff]  ;;  %v890_v12 = vld [vmem:[#allocation2 + $0x20] sm:$0xff]  ;;  %v889_v16 = vld [vmem:[#allocation2 + $0x18] sm:$0xff] }
  0x11   :  { %474 = vmatpush.bf16.msra.mxu0 %v892_v4  ;;  %v898_v13 = vld [vmem:[#allocation2 + $0x60] sm:$0xff]  ;;  %v897_v17 = vld [vmem:[#allocation2 + $0x58] sm:$0xff]  ;;  %v888_v20 = vld [vmem:[#allocation2 + $0x10] sm:$0xff] }
  0x12   :  { %488 = vmatpush.bf16.msra.mxu1 %v900_v5  ;;  %v906_v14 = vld [vmem:[#allocation2 + $0xa0] sm:$0xff]  ;;  %v905_v18 = vld [vmem:[#allocation2 + $0x98] sm:$0xff]  ;;  %v896_v21 = vld [vmem:[#allocation2 + $0x50] sm:$0xff] }
  0x13   :  { %502 = vmatpush.bf16.msra.mxu2 %v908_v6  ;;  %v914_v15 = vld [vmem:[#allocation2 + $0xe0] sm:$0xff]  ;;  %v913_v19 = vld [vmem:[#allocation2 + $0xd8] sm:$0xff]  ;;  %v904_v22 = vld [vmem:[#allocation2 + $0x90] sm:$0xff] }
  0x14   :  { %516 = vmatpush.bf16.msra.mxu3 %v916_v7  ;;  %v912_v23 = vld [vmem:[#allocation2 + $0xd0] sm:$0xff]  ;;  %v887_v24 = vld [vmem:[#allocation2 + $0x8] sm:$0xff]  ;;  %v886_v28 = vld [vmem:[#allocation2] sm:$0xff] }
  0x15   :  { %475 = vmatpush.bf16.msra.mxu0 %v891_v8  ;;  %v895_v25 = vld [vmem:[#allocation2 + $0x48] sm:$0xff]  ;;  %v894_v29 = vld [vmem:[#allocation2 + $0x40] sm:$0xff]  ;;  %v883_v31 = vld [vmem:[%s1083_s0 + $0x14] sm:$0xf0] }
  0x16   :  { %489 = vmatpush.bf16.msra.mxu1 %v899_v9  ;;  %v903_v26 = vld [vmem:[#allocation2 + $0x88] sm:$0xff]  ;;  %v666_v30 = vld [vmem:[%s1083_s0] sm:$0xf]  ;;  %v880_v32 = vld [vmem:[%s1083_s0 + $0x4] sm:$0xf] }
  0x17   :  { %503 = vmatpush.bf16.msra.mxu2 %v907_v10  ;;  %v911_v27 = vld [vmem:[#allocation2 + $0xc8] sm:$0xff]  ;;  %v668_v33 = vld [vmem:[%s1083_s0 + $0x18] sm:$0xf0]  ;;  %v902_v36 = vld [vmem:[#allocation2 + $0x80] sm:$0xff]  ;;  %v667_v40 = vor.u32 %v883_v31, %v666_v30 }
  0x18   :  { %517 = vmatpush.bf16.msra.mxu3 %v915_v11  ;;  %v925_v34 = vld [vmem:[#allocation2 + $0x138] sm:$0xff]  ;;  %v910_v37 = vld [vmem:[#allocation2 + $0xc0] sm:$0xff]  ;;  %v674_v38 = vld [vmem:[%s1083_s0 + $0x8] sm:$0xf]  ;;  %v671_v43 = vor.u32 %v880_v32, %v668_v33 }
  0x19   :  { %476 = vmatpush.bf16.msra.mxu0 %v890_v12  ;;  %v933_v35 = vld [vmem:[#allocation2 + $0x178] sm:$0xff]  ;;  %v884_v39 = vld [vmem:[%s1083_s0 + $0x1c] sm:$0xf0]  ;;  %v881_v41 = vld [vmem:[%s1083_s0 + $0xc] sm:$0xf] }
  0x1a   :  { %490 = vmatpush.bf16.msra.mxu1 %v898_v13  ;;  %v676_v42 = vld [vmem:[%s1083_s0 + $0x20] sm:$0xf0]  ;;  %v924_v44 = vld [vmem:[#allocation2 + $0x130] sm:$0xff]  ;;  %v675_v46 = vor.u32 %v884_v39, %v674_v38  ;;  %v923_v48 = vld [vmem:[#allocation2 + $0x128] sm:$0xff] }
  0x1b   :  { %504 = vmatpush.bf16.msra.mxu2 %v906_v14  ;;  %v932_v45 = vld [vmem:[#allocation2 + $0x170] sm:$0xff]  ;;  %v679_v47 = vor.u32 %v881_v41, %v676_v42  ;;  %v931_v49 = vld [vmem:[#allocation2 + $0x168] sm:$0xff]  ;;  %v922_v50 = vld [vmem:[#allocation2 + $0x120] sm:$0xff] }
  0x1c   :  { %518 = vmatpush.bf16.msra.mxu3 %v914_v15  ;;  %v930_v51 = vld [vmem:[#allocation2 + $0x160] sm:$0xff]  ;;  %v921_v52 = vld [vmem:[#allocation2 + $0x118] sm:$0xff]  ;;  %v920_v54 = vld [vmem:[#allocation2 + $0x110] sm:$0xff] }
  0x1d   :  { %477 = vmatpush.bf16.msra.mxu0 %v889_v16  ;;  %v929_v53 = vld [vmem:[#allocation2 + $0x158] sm:$0xff]  ;;  %v928_v55 = vld [vmem:[#allocation2 + $0x150] sm:$0xff]  ;;  %v919_v56 = vld [vmem:[#allocation2 + $0x108] sm:$0xff] }
  0x1e   :  { %491 = vmatpush.bf16.msra.mxu1 %v897_v17  ;;  %v927_v57 = vld [vmem:[#allocation2 + $0x148] sm:$0xff]  ;;  %v918_v58 = vld [vmem:[#allocation2 + $0x100] sm:$0xff]  ;;  %v682_v60 = vld [vmem:[%s1083_s0 + $0x10] sm:$0xf] }
  0x1f   :  { %505 = vmatpush.bf16.msra.mxu2 %v905_v18  ;;  %v926_v59 = vld [vmem:[#allocation2 + $0x140] sm:$0xff]  ;;  %v885_v61 = vld [vmem:[%s1083_s0 + $0x24] sm:$0xf0]  ;;  %v882_v62 = vld [vmem:[%s1083_s0 + $0x14] sm:$0xf] }
  0x20   :  { %519 = vmatpush.bf16.msra.mxu3 %v913_v19  ;;  %v684_v63 = vld [vmem:[%s1083_s0 + $0x28] sm:$0xf0]  ;;  %v683_v0 = vor.u32 %v885_v61, %v682_v60  ;;  %v940_v4 = vld [vmem:[%s1085_s2] ss:$0 sm:$0xff]  ;;  %v602_v5 = vld [vmem:[#allocation4 + $0x78] sm:$0xff] }
  0x21   :  { %478 = vmatpush.bf16.msra.mxu0 %v888_v20  ;;  %v687_v1 = vor.u32 %v882_v62, %v684_v63  ;;  %v601_v6 = vld [vmem:[#allocation4 + $0x70] sm:$0xff]  ;;  %v600_v7 = vld [vmem:[#allocation4 + $0x68] sm:$0xff]  ;;  %v599_v9 = vld [vmem:[#allocation4 + $0x60] sm:$0xff] }
  0x22   :  { %492 = vmatpush.bf16.msra.mxu1 %v896_v21  ;;  %v598_v11 = vld [vmem:[#allocation4 + $0x58] sm:$0xff]  ;;  %v593_v38 = vld [vmem:[#allocation4 + $0x30] sm:$0xff]  ;;  %v592_v39 = vld [vmem:[#allocation4 + $0x28] sm:$0xff] }
  0x23   :  { %506 = vmatpush.bf16.msra.mxu2 %v904_v22  ;;  %v590_v41 = vld [vmem:[#allocation4 + $0x18] sm:$0xff]  ;;  %v589_v42 = vld [vmem:[#allocation4 + $0x10] sm:$0xff] }
  0x24   :  { %520 = vmatpush.bf16.msra.mxu3 %v912_v23 }
  0x25   :  { %479 = vmatpush.bf16.msra.mxu0 %v887_v24 }
  0x26   :  { %493 = vmatpush.bf16.msra.mxu1 %v895_v25 }
  0x27   :  { %507 = vmatpush.bf16.msra.mxu2 %v903_v26 }
  0x28   :  { %521 = vmatpush.bf16.msra.mxu3 %v911_v27 }
  0x29   :  { %480 = vmatpush.bf16.msra.mxu0 %v886_v28 }
  0x2a   :  { %494 = vmatpush.bf16.msra.mxu1 %v894_v29 }
  0x2b   :  { %508 = vmatpush.bf16.msra.mxu2 %v902_v36  ;;  %v595_v36 = vld [vmem:[#allocation4 + $0x40] sm:$0xff] }
  0x2c   :  { %522 = vmatpush.bf16.msra.mxu3 %v910_v37  ;;  %481 = vmatmul.bf16.vlgmr.msra.gmra.mxu0 %v667_v40  ;;  %v594_v37 = vld [vmem:[#allocation4 + $0x38] sm:$0xff]  ;;  %v591_v40 = vld [vmem:[#allocation4 + $0x20] sm:$0xff] }
  0x2d   :  { %529 = vmatpush.bf16.msrb.mxu0 %v925_v34  ;;  %495 = vmatmul.bf16.vlgmr.msra.gmra.mxu1 %v671_v43  ;;  %v597_v34 = vld [vmem:[#allocation4 + $0x50] sm:$0xff]  ;;  %v588_v43 = vld [vmem:[#allocation4 + $0x8] sm:$0xff] }
  0x2e   :  { %543 = vmatpush.bf16.msrb.mxu1 %v933_v35  ;;  %509 = vmatmul.bf16.vlgmr.msra.gmra.mxu2 %v675_v46  ;;  %v596_v35 = vld [vmem:[#allocation4 + $0x48] sm:$0xff] }
  0x2f   :  { %523 = vmatmul.bf16.vlgmr.msra.gmra.mxu3 %v679_v47  ;;  %603 = vmatpush.msrb.mxu2 %v602_v5 }
  0x31   :  { %530 = vmatpush.bf16.msrb.mxu0 %v924_v44  ;;  %604 = vmatpush.msrb.mxu2 %v601_v6  ;;  %v587_v44 = vld [vmem:[#allocation4] sm:$0xff] }
  0x32   :  { %544 = vmatpush.bf16.msrb.mxu1 %v932_v45 }
  0x33   :  { %605 = vmatpush.msrb.mxu2 %v600_v7 }
  0x35   :  { %531 = vmatpush.bf16.msrb.mxu0 %v923_v48  ;;  %606 = vmatpush.msrb.mxu2 %v599_v9 }
  0x36   :  { %545 = vmatpush.bf16.msrb.mxu1 %v931_v49 }
  0x37   :  { %607 = vmatpush.msrb.mxu2 %v598_v11 }
  0x39   :  { %532 = vmatpush.bf16.msrb.mxu0 %v922_v50  ;;  %608 = vmatpush.msrb.mxu2 %v597_v34 }
  0x3a   :  { %546 = vmatpush.bf16.msrb.mxu1 %v930_v51 }
  0x3b   :  { %609 = vmatpush.msrb.mxu2 %v596_v35 }
  0x3d   :  { %533 = vmatpush.bf16.msrb.mxu0 %v921_v52  ;;  %610 = vmatpush.msrb.mxu2 %v595_v36 }
  0x3e   :  { %547 = vmatpush.bf16.msrb.mxu1 %v929_v53 }
  0x3f   :  { %611 = vmatpush.msrb.mxu2 %v594_v37 }
  0x41   :  { %534 = vmatpush.bf16.msrb.mxu0 %v920_v54  ;;  %612 = vmatpush.msrb.mxu2 %v593_v38 }
  0x42   :  { %548 = vmatpush.bf16.msrb.mxu1 %v928_v55 }
  0x43   :  { %613 = vmatpush.msrb.mxu2 %v592_v39 }
  0x45   :  { %535 = vmatpush.bf16.msrb.mxu0 %v919_v56  ;;  %614 = vmatpush.msrb.mxu2 %v591_v40 }
  0x46   :  { %549 = vmatpush.bf16.msrb.mxu1 %v927_v57 }
  0x47   :  { %615 = vmatpush.msrb.mxu2 %v590_v41 }
  0x49   :  { %536 = vmatpush.bf16.msrb.mxu0 %v918_v58  ;;  %616 = vmatpush.msrb.mxu2 %v589_v42 }
  0x4a   :  { %550 = vmatpush.bf16.msrb.mxu1 %v926_v59 }
  0x4b   :  { %617 = vmatpush.msrb.mxu2 %v588_v43 }
  0x4c   :  { %537 = vmatmul.bf16.vlgmr.msrb.gmra.mxu0 %v683_v0 }
  0x4d   :  { %551 = vmatmul.bf16.vlgmr.msrb.gmra.mxu1 %v687_v1  ;;  %618 = vmatpush.msrb.mxu2 %v587_v44 }
  0xa9   :  { %v482_v2 = vpop.f32.mrf.mxu0 }
  0xaa   :  { %v496_v3 = vpop.f32.mrf.mxu1  ;;  %v483_v8 = vadd.f32 %v940_v4, %v482_v2 }
  0xac   :  { %v497_v12 = vadd.f32 %v496_v3, %v483_v8 }
  0xb1   :  { %v510_v10 = vpop.f32.mrf.mxu2  ;;  %v484_v13 = vpop.f32.mrf.mxu0 }
  0xb2   :  { %v498_v14 = vpop.f32.mrf.mxu1  ;;  %v524_v15 = vpop.f32.mrf.mxu3  ;;  %v511_v16 = vadd.f32 %v510_v10, %v497_v12  ;;  %v485_v17 = vadd.f32 %v940_v4, %v484_v13 }
  0xb4   :  { %v525_v18 = vadd.f32 %v524_v15, %v511_v16  ;;  %v499_v19 = vadd.f32 %v498_v14, %v485_v17 }
  0xb9   :  { %v512_v20 = vpop.f32.mrf.mxu2 }
  0xba   :  { %v513_v24 = vadd.f32 %v512_v20, %v499_v19  ;;  %v526_v26 = vpop.f32.mrf.mxu3 }
  0xbc   :  { %v527_v28 = vadd.f32 %v526_v26, %v513_v24 }
  0xc9   :  { %v538_v21 = vpop.f32.mrf.mxu0 }
  0xca   :  { %v552_v22 = vpop.f32.mrf.mxu1  ;;  %v539_v23 = vadd.f32 %v538_v21, %v525_v18 }
  0xcc   :  { %v553_v25 = vadd.f32 %v552_v22, %v539_v23 }
  0xce   :  { %v557_v27 = vmul.f32 %v553_v25, %v553_v25 }
  0xd0   :  { %559 = vadd.xlane.f32.xlu0 %v557_v27 }
  0xd1   :  { %v540_v29 = vpop.f32.mrf.mxu0 }
  0xd2   :  { %v541_v30 = vadd.f32 %v540_v29, %v527_v28  ;;  %v554_v31 = vpop.f32.mrf.mxu1 }
  0xd4   :  { %v555_v32 = vadd.f32 %v554_v31, %v541_v30 }
  0xd6   :  { %v558_v33 = vmul.f32 %v555_v32, %v555_v32 }
  0xd8   :  { %561 = vadd.xlane.f32.xlu0 %v558_v33 }
 0x143   :  { %v560_v45 = vpop.xlane.xlu0 %559 }
 0x144   :  { %v563_v46 = vmax.f32 %v560_v45, 1e-24 }
 0x146   :  { %941 = vrsqrt.f32 %v563_v46  ;;  %vm571_vm1 = vweird.f32 %v563_v46 }
 0x14b   :  { %v562_v47 = vpop.xlane.xlu0 %561 }
 0x14c   :  { %v942_v48 = vpop.eup %941  ;;  %v564_v49 = vmax.f32 %v562_v47, 1e-24 }
 0x14d   :  { %v566_v50 = vmul.f32 %v942_v48, %v563_v46  ;;  %vm572_vm0 = vweird.f32 %v942_v48 }
 0x14e   :  { %943 = vrsqrt.f32 %v564_v49  ;;  %vm573_vm2 = vmor %vm571_vm1, %vm572_vm0  ;;  %vm581_vm4 = vweird.f32 %v564_v49 }
 0x14f   :  { %v567_v51 = vmul.f32 %v942_v48, %v566_v50 }
 0x151   :  { %v568_v52 = vmul.f32 0.5, %v567_v51 }
 0x153   :  { %v569_v53 = vsub.f32 1.5, %v568_v52 }
 0x154   :  { %v944_v54 = vpop.eup %943 }
 0x155   :  { %v576_v55 = vmul.f32 %v944_v54, %v564_v49  ;;  %v570_v56 = vmul.f32 %v942_v48, %v569_v53  ;;  %vm582_vm3 = vweird.f32 %v944_v54 }
 0x156   :  { %vm583_vm5 = vmor %vm581_vm4, %vm582_vm3 }
 0x157   :  { %v577_v57 = vmul.f32 %v944_v54, %v576_v55  ;;  %v574_v58 = vsel %vm573_vm2, %v942_v48, %v570_v56 }
 0x158   :  { %v585_v59 = vmul.f32 %v574_v58, %v553_v25 }
 0x159   :  { %v578_v60 = vmul.f32 0.5, %v577_v57 }
 0x15a   :  { %619 = vmatmul.f32.vlgmr.msrb.gmra.mxu2 %v585_v59 }
 0x15b   :  { %v579_v61 = vsub.f32 1.5, %v578_v60 }
 0x15d   :  { %v580_v62 = vmul.f32 %v944_v54, %v579_v61 }
 0x15f   :  { %v584_v63 = vsel %vm583_vm5, %v944_v54, %v580_v62 }
 0x160   :  { %v586_v0 = vmul.f32 %v584_v63, %v555_v32 }
 0x162   :  { %622 = vmatmul.f32.gmra.mxu2 %v586_v0 }
 0x1dd   :  { %v620_v1 = vpop.f32.mrf.mxu2 }
 0x1de   :  { %v626_v2 = vmul.f32 2.0, %v620_v1 }
 0x1e0   :  { %v628_v3 = vsub.f32 2.0, %v626_v2 }
 0x1e2   :  { %v630_v4 = vmax.f32 %v628_v3, 0.0 }
 0x1e4   :  { %945 = vrsqrt.f32 %v630_v4  ;;  %vm639_vm6 = vcmp.eq.f32.partialorder %v630_v4, inf  ;;  %v642_v19 = vand.u32 2147483648, %v630_v4  ;;  %vm641_vm7 = vcmp.eq.f32.partialorder %v630_v4, 0.0 }
 0x1e5   :  { %v623_v5 = vpop.f32.mrf.mxu2 }
 0x1e6   :  { %v627_v6 = vmul.f32 2.0, %v623_v5 }
 0x1e8   :  { %v629_v7 = vsub.f32 2.0, %v627_v6 }
 0x1ea   :  { %v946_v8 = vpop.eup %945  ;;  %v631_v9 = vmax.f32 %v629_v7, 0.0 }
 0x1eb   :  { %v633_v10 = vmul.f32 %v946_v8, %v630_v4 }
 0x1ec   :  { %947 = vrsqrt.f32 %v631_v9  ;;  %vm651_vm8 = vcmp.eq.f32.partialorder %v631_v9, inf  ;;  %v654_v26 = vand.u32 2147483648, %v631_v9  ;;  %vm653_vm9 = vcmp.eq.f32.partialorder %v631_v9, 0.0 }
 0x1ed   :  { %v634_v11 = vmul.f32 %v946_v8, %v633_v10 }
 0x1ef   :  { %v635_v12 = vmul.f32 0.5, %v634_v11 }
 0x1f1   :  { %v636_v13 = vsub.f32 1.5, %v635_v12 }
 0x1f2   :  { %v948_v14 = vpop.eup %947 }
 0x1f3   :  { %v637_v15 = vmul.f32 %v946_v8, %v636_v13  ;;  %v645_v16 = vmul.f32 %v948_v14, %v631_v9 }
 0x1f5   :  { %v638_v17 = vmul.f32 %v637_v15, %v630_v4  ;;  %v646_v18 = vmul.f32 %v948_v14, %v645_v16 }
 0x1f7   :  { %v640_v20 = vsel %vm639_vm6, %v630_v4, %v638_v17  ;;  %v647_v21 = vmul.f32 0.5, %v646_v18 }
 0x1f8   :  { %v643_v22 = vsel %vm641_vm7, %v642_v19, %v640_v20 }
 0x1f9   :  { %656 = vst [vmem:[%s1087_s4] sm:$0xff] %v643_v22  ;;  %v648_v23 = vsub.f32 1.5, %v647_v21 }
 0x1fb   :  { %v649_v24 = vmul.f32 %v948_v14, %v648_v23 }
 0x1fd   :  { %v650_v25 = vmul.f32 %v649_v24, %v631_v9 }
 0x1ff   :  { %v652_v27 = vsel %vm651_vm8, %v631_v9, %v650_v25 }
 0x200   :  { %v655_v28 = vsel %vm653_vm9, %v654_v26, %v652_v27 }
 0x201   :  { %657 = vst [vmem:[%s1087_s4 + $0x8] sm:$0xff] %v655_v28 }
 0x202   :  { %662 = vsyncpa [#allocation3], 1 }
 0x203   :  { %663 = vsyncpa [#allocation5], 1 }

</bundles_post_ra>
